<compile_context>
chip_gen: v5e
topology: v5e:2x2
jax: 0.10.0
libtpu: 0.0.40
codegen_flags: <defaults>
</compile_context>

<pallas_src>
import functools

import jax
import jax.numpy as jnp
from jax.experimental import pallas as pl
from jax.experimental.pallas import tpu as pltpu


def _round_up(x, m):
    return (x + m - 1) // m * m


def _cdiv(a, b):
    return -(-a // b)


def resmlp_kernel(x_ref, w1_ref, b1_ref, w2_ref, b2_ref, w3_ref, b3_ref, o_ref):
    # Linear 1 + ReLU   (bf16 MXU operands, f32 accumulate / epilogue)
    h = jnp.dot(x_ref[...].astype(jnp.bfloat16), w1_ref[...],
                preferred_element_type=jnp.float32) + b1_ref[...]
    h = jnp.maximum(h, 0.0)

    # Linear 2 + Tanh
    h = jnp.dot(h.astype(jnp.bfloat16), w2_ref[...],
                preferred_element_type=jnp.float32) + b2_ref[...]
    h = jnp.tanh(h)

    # Linear 3 + residual (re-read x in f32: full precision, short live range)
    y = jnp.dot(h.astype(jnp.bfloat16), w3_ref[...],
                preferred_element_type=jnp.float32) + b3_ref[...]
    o_ref[...] = (y + x_ref[...]).astype(o_ref.dtype)


def _device_config():
    """(vmem_budget_bytes, min_grid_steps) derived from the local TPU."""
    vmem_cap = 64 * 1024 * 1024            # conservative fallback (v7x per-TC)
    try:
        info = pltpu.get_tpu_info()
        vmem_cap = int(info.vmem_capacity_bytes)
    except Exception:
        pass
    # ~3/4 of physical VMEM: ~96 MiB on v5e/v6e (128 MiB), ~48 MiB on v7x (64 MiB).
    budget = max((vmem_cap * 3) // 4, 32 * 1024 * 1024)
    # Heuristic: < 100 MiB per-core VMEM => v7x-class chip with 2 TensorCores;
    # require >= 2 parallel grid steps so both cores are used.
    min_steps = 2 if vmem_cap < 100 * 1024 * 1024 else 1
    return int(budget), int(min_steps)


def _pick_tile_b(batch, Fp, Dp, vmem_budget_bytes, cap=4096):
    """Largest multiple-of-8 batch tile that fits the VMEM budget."""
    # Resident weights/biases: constant index_map + Buffered(1) => single copy.
    w_bytes = 2 * (Fp * Dp + Dp * Dp + Dp * Fp)          # bf16, x1 buffer
    b_bytes = 4 * (2 * Dp + Fp)                          # f32,  x1 buffer
    fixed = w_bytes + b_bytes + (4 << 20)                # + headroom
    # Per-row: x tile (f32, x2 buffers) + out tile (f32, x2 buffers)
    #          + f32 intermediates + bf16 casts.
    per_row = 2 * 4 * Fp + 2 * 4 * Fp + 4 * (Fp + Dp) + 2 * (Fp + Dp)
    avail = max(vmem_budget_bytes - fixed, per_row * 8)
    tile = int(avail // per_row)
    tile = max(8, min(cap, tile) // 8 * 8)
    return min(tile, _round_up(batch, 8))


def prepare_params(params_f32, feature_dim, bottleneck_dim):
    """Pad feature/bottleneck dims to multiples of 128; weights -> bf16."""
    Fp = _round_up(feature_dim, 128)
    Dp = _round_up(bottleneck_dim, 128)

    def pad_w(w, rows, cols):
        return jnp.pad(w, ((0, rows - w.shape[0]), (0, cols - w.shape[1])))

    def pad_b(b, cols):
        return jnp.pad(b, ((0, 0), (0, cols - b.shape[1])))

    return {
        "w1": pad_w(params_f32["w1"], Fp, Dp).astype(jnp.bfloat16),
        "b1": pad_b(params_f32["b1"], Dp).astype(jnp.float32),
        "w2": pad_w(params_f32["w2"], Dp, Dp).astype(jnp.bfloat16),
        "b2": pad_b(params_f32["b2"], Dp).astype(jnp.float32),
        "w3": pad_w(params_f32["w3"], Dp, Fp).astype(jnp.bfloat16),
        "b3": pad_b(params_f32["b3"], Fp).astype(jnp.float32),
    }, Fp, Dp


@functools.partial(jax.jit, static_argnames=("feature_dim", "bottleneck_dim",
                                             "vmem_budget_bytes",
                                             "min_grid_steps"))
def _resmlp_forward(x, padded_params, *, feature_dim, bottleneck_dim,
                    vmem_budget_bytes, min_grid_steps):
    B, F = x.shape
    assert F == feature_dim
    D = bottleneck_dim
    Fp = _round_up(feature_dim, 128)
    Dp = _round_up(bottleneck_dim, 128)

    tile_b = _pick_tile_b(B, Fp, Dp, vmem_budget_bytes)
    # v7x: guarantee >= 2 "parallel" grid steps so both TensorCores get work.
    # Harmless on single-TC chips; skipped for tiny batches (< 8 rows/step).
    if min_grid_steps > 1 and B >= 8 * min_grid_steps:
        tile_b = min(tile_b, _round_up(_cdiv(B, min_grid_steps), 8))
    Bp = _round_up(max(B, tile_b), tile_b)

    # Zero-pad batch and feature dims (layout plumbing; sliced off below).
    x_p = jnp.pad(x.astype(jnp.float32), ((0, Bp - B), (0, Fp - F)))

    grid = (Bp // tile_b,)
    # Constant-index resident operands: single-buffered (no pipelining benefit;
    # halves their VMEM footprint -> larger batch tile).
    const = lambda shape: pl.BlockSpec(shape, lambda i: (0, 0),
                                       pipeline_mode=pl.Buffered(1))

    # Advisory cost for XLA scheduling: true (unpadded) dims, weights once.
    flops = 2 * B * (F * D + D * D + D * F)
    bytes_accessed = (2 * B * F * 4                     # x in + out (f32)
                      + 2 * (F * D + D * D + D * F)     # bf16 weights, once
                      + 4 * (2 * D + F))                # f32 biases, once
    cost = pl.CostEstimate(flops=flops, transcendentals=B * D,
                           bytes_accessed=bytes_accessed)

    out_p = pl.pallas_call(
        resmlp_kernel,
        out_shape=jax.ShapeDtypeStruct((Bp, Fp), x.dtype),
        grid_spec=pltpu.PrefetchScalarGridSpec(
            num_scalar_prefetch=0,
            grid=grid,
            in_specs=[
                pl.BlockSpec((tile_b, Fp), lambda i: (i, 0)),   # x tile (f32)
                const((Fp, Dp)),                                # w1 (bf16)
                const((1, Dp)),                                 # b1 (f32)
                const((Dp, Dp)),                                # w2 (bf16)
                const((1, Dp)),                                 # b2 (f32)
                const((Dp, Fp)),                                # w3 (bf16)
                const((1, Fp)),                                 # b3 (f32)
            ],
            out_specs=pl.BlockSpec((tile_b, Fp), lambda i: (i, 0)),
        ),
        compiler_params=pltpu.CompilerParams(
            dimension_semantics=("parallel",),
            vmem_limit_bytes=int(vmem_budget_bytes),
        ),
        cost_estimate=cost,
    )(x_p, padded_params["w1"], padded_params["b1"],
      padded_params["w2"], padded_params["b2"],
      padded_params["w3"], padded_params["b3"])

    return out_p[:B, :F]


def resmlp_forward(x, padded_params, *, feature_dim, bottleneck_dim,
                   vmem_budget_bytes=None, min_grid_steps=None):
    """x: (B, feature_dim) f32. padded_params: output of prepare_params()."""
    if vmem_budget_bytes is None or min_grid_steps is None:
        budget, steps = _device_config()
        if vmem_budget_bytes is None:
            vmem_budget_bytes = budget
        if min_grid_steps is None:
            min_grid_steps = steps
    return _resmlp_forward(x, padded_params,
                           feature_dim=feature_dim,
                           bottleneck_dim=bottleneck_dim,
                           vmem_budget_bytes=int(vmem_budget_bytes),
                           min_grid_steps=int(min_grid_steps))


def init_params(key, feature_dim, bottleneck_dim, dtype=jnp.float32):
    """Deterministic synthetic init (Kaiming-uniform-ish like nn.Linear)."""
    ks = jax.random.split(key, 6)

    def lin(kw, kb, fan_in, fan_out):
        bound = 1.0 / jnp.sqrt(fan_in)
        w = jax.random.uniform(kw, (fan_in, fan_out), dtype, -bound, bound)
        b = jax.random.uniform(kb, (1, fan_out), dtype, -bound, bound)
        return w, b

    w1, b1 = lin(ks[0], ks[1], feature_dim, bottleneck_dim)
    w2, b2 = lin(ks[2], ks[3], bottleneck_dim, bottleneck_dim)
    w3, b3 = lin(ks[4], ks[5], bottleneck_dim, feature_dim)
    return {"w1": w1, "b1": b1, "w2": w2, "b2": b2, "w3": w3, "b3": b3}


def resmlp_reference(x, p):
    h = jnp.maximum(x @ p["w1"] + p["b1"], 0.0)
    h = jnp.tanh(h @ p["w2"] + p["b2"])
    return (h @ p["w3"] + p["b3"]) + x


if __name__ == "__main__":
    key = jax.random.PRNGKey(0)
    k_x, k_p = jax.random.split(key)

    batch = 8
    feature_dim = 32
    bottleneck_dim = 16

    x = jax.random.normal(k_x, (batch, feature_dim), dtype=jnp.float32)
    params_f32 = init_params(k_p, feature_dim, bottleneck_dim)
    padded_params, _, _ = prepare_params(params_f32, feature_dim, bottleneck_dim)

    out = resmlp_forward(x, padded_params,
                         feature_dim=feature_dim,
                         bottleneck_dim=bottleneck_dim)
    out = jax.block_until_ready(out)

    ref = resmlp_reference(x, params_f32)
    assert out.shape == (batch, feature_dim)
    # bf16 MXU operands (f32 accumulate) -> small, bounded deviation from f32.
    assert jnp.allclose(out, ref, atol=3e-2, rtol=1e-2), "mismatch vs reference"

    print("KERNEL_OK")
</pallas_src>

<mosaic_0001>
module attributes {stable_mosaic.version = 11 : i64} {
  func.func @resmlp_kernel(%arg0: i32, %arg1: memref<8x128xf32, #tpu.memory_space<vmem>>, %arg2: memref<128x128xbf16, #tpu.memory_space<vmem>>, %arg3: memref<1x128xf32, #tpu.memory_space<vmem>>, %arg4: memref<128x128xbf16, #tpu.memory_space<vmem>>, %arg5: memref<1x128xf32, #tpu.memory_space<vmem>>, %arg6: memref<128x128xbf16, #tpu.memory_space<vmem>>, %arg7: memref<1x128xf32, #tpu.memory_space<vmem>>, %arg8: memref<8x128xf32, #tpu.memory_space<vmem>>) attributes {dimension_semantics = [#tpu.dimension_semantics<parallel>], iteration_bounds = array<i64: 1>, scalar_prefetch = 0 : i64, scratch_operands = 0 : i64, tpu.core_type = #tpu.core_type<tc>, window_params = [{transform_indices = @transform_0, window_bounds = array<i64: 8, 128>}, {pipeline_mode = #tpu.pipeline_mode<synchronous>, transform_indices = @transform_1, window_bounds = array<i64: 128, 128>}, {pipeline_mode = #tpu.pipeline_mode<synchronous>, transform_indices = @transform_2, window_bounds = array<i64: 1, 128>}, {pipeline_mode = #tpu.pipeline_mode<synchronous>, transform_indices = @transform_3, window_bounds = array<i64: 128, 128>}, {pipeline_mode = #tpu.pipeline_mode<synchronous>, transform_indices = @transform_4, window_bounds = array<i64: 1, 128>}, {pipeline_mode = #tpu.pipeline_mode<synchronous>, transform_indices = @transform_5, window_bounds = array<i64: 128, 128>}, {pipeline_mode = #tpu.pipeline_mode<synchronous>, transform_indices = @transform_6, window_bounds = array<i64: 1, 128>}, {transform_indices = @transform_7, window_bounds = array<i64: 8, 128>}]} {
    %c0 = arith.constant 0 : index
    %c0_0 = arith.constant 0 : index
    %0 = vector.load %arg1[%c0, %c0_0] : memref<8x128xf32, #tpu.memory_space<vmem>>, vector<8x128xf32>
    %1 = arith.truncf %0 : vector<8x128xf32> to vector<8x128xbf16>
    %c0_1 = arith.constant 0 : index
    %c0_2 = arith.constant 0 : index
    %2 = vector.load %arg2[%c0_1, %c0_2] : memref<128x128xbf16, #tpu.memory_space<vmem>>, vector<128x128xbf16>
    %cst = arith.constant dense<0.000000e+00> : vector<8x128xf32>
    %3 = tpu.matmul %1, %2, %cst {dimension_numbers = #tpu.dot_dimension_numbers<[1], [0], [0], [1], [0, 0, 1, 1], [], []>} : vector<8x128xbf16>, vector<128x128xbf16>, vector<8x128xf32> -> vector<8x128xf32>
    %c0_3 = arith.constant 0 : index
    %c0_4 = arith.constant 0 : index
    %4 = vector.load %arg3[%c0_3, %c0_4] : memref<1x128xf32, #tpu.memory_space<vmem>>, vector<1x128xf32>
    %5 = vector.broadcast %4 : vector<1x128xf32> to vector<8x128xf32>
    %6 = arith.addf %3, %5 : vector<8x128xf32>
    %cst_5 = arith.constant 0.000000e+00 : f32
    %7 = vector.broadcast %cst_5 : f32 to vector<8x128xf32>
    %8 = arith.maximumf %6, %7 : vector<8x128xf32>
    %9 = arith.truncf %8 : vector<8x128xf32> to vector<8x128xbf16>
    %c0_6 = arith.constant 0 : index
    %c0_7 = arith.constant 0 : index
    %10 = vector.load %arg4[%c0_6, %c0_7] : memref<128x128xbf16, #tpu.memory_space<vmem>>, vector<128x128xbf16>
    %cst_8 = arith.constant dense<0.000000e+00> : vector<8x128xf32>
    %11 = tpu.matmul %9, %10, %cst_8 {dimension_numbers = #tpu.dot_dimension_numbers<[1], [0], [0], [1], [0, 0, 1, 1], [], []>} : vector<8x128xbf16>, vector<128x128xbf16>, vector<8x128xf32> -> vector<8x128xf32>
    %c0_9 = arith.constant 0 : index
    %c0_10 = arith.constant 0 : index
    %12 = vector.load %arg5[%c0_9, %c0_10] : memref<1x128xf32, #tpu.memory_space<vmem>>, vector<1x128xf32>
    %13 = vector.broadcast %12 : vector<1x128xf32> to vector<8x128xf32>
    %14 = arith.addf %11, %13 : vector<8x128xf32>
    %15 = math.tanh %14 : vector<8x128xf32>
    %16 = arith.truncf %15 : vector<8x128xf32> to vector<8x128xbf16>
    %c0_11 = arith.constant 0 : index
    %c0_12 = arith.constant 0 : index
    %17 = vector.load %arg6[%c0_11, %c0_12] : memref<128x128xbf16, #tpu.memory_space<vmem>>, vector<128x128xbf16>
    %cst_13 = arith.constant dense<0.000000e+00> : vector<8x128xf32>
    %18 = tpu.matmul %16, %17, %cst_13 {dimension_numbers = #tpu.dot_dimension_numbers<[1], [0], [0], [1], [0, 0, 1, 1], [], []>} : vector<8x128xbf16>, vector<128x128xbf16>, vector<8x128xf32> -> vector<8x128xf32>
    %c0_14 = arith.constant 0 : index
    %c0_15 = arith.constant 0 : index
    %19 = vector.load %arg7[%c0_14, %c0_15] : memref<1x128xf32, #tpu.memory_space<vmem>>, vector<1x128xf32>
    %20 = vector.broadcast %19 : vector<1x128xf32> to vector<8x128xf32>
    %21 = arith.addf %18, %20 : vector<8x128xf32>
    %c0_16 = arith.constant 0 : index
    %c0_17 = arith.constant 0 : index
    %22 = vector.load %arg1[%c0_16, %c0_17] : memref<8x128xf32, #tpu.memory_space<vmem>>, vector<8x128xf32>
    %23 = arith.addf %21, %22 : vector<8x128xf32>
    %c0_18 = arith.constant 0 : index
    %c0_19 = arith.constant 0 : index
    %24 = vector.load %arg8[%c0_18, %c0_19] : memref<8x128xf32, #tpu.memory_space<vmem>>, vector<8x128xf32>
    tpu.vector_store %arg8[%c0_18, %c0_19], %23 {strides = array<i32>} : memref<8x128xf32, #tpu.memory_space<vmem>>, vector<8x128xf32>,
    return
  }
  func.func @transform_0(%arg0: i32) -> (i32, i32) {
    %c0_i32 = arith.constant 0 : i32
    %c0_i32_0 = arith.constant 0 : i32
    return %arg0, %c0_i32 : i32, i32
  }
  func.func @transform_1(%arg0: i32) -> (i32, i32) {
    %c0_i32 = arith.constant 0 : i32
    %c0_i32_0 = arith.constant 0 : i32
    %c0_i32_1 = arith.constant 0 : i32
    return %c0_i32, %c0_i32_0 : i32, i32
  }
  func.func @transform_2(%arg0: i32) -> (i32, i32) {
    %c0_i32 = arith.constant 0 : i32
    %c0_i32_0 = arith.constant 0 : i32
    %c0_i32_1 = arith.constant 0 : i32
    return %c0_i32, %c0_i32_0 : i32, i32
  }
  func.func @transform_3(%arg0: i32) -> (i32, i32) {
    %c0_i32 = arith.constant 0 : i32
    %c0_i32_0 = arith.constant 0 : i32
    %c0_i32_1 = arith.constant 0 : i32
    return %c0_i32, %c0_i32_0 : i32, i32
  }
  func.func @transform_4(%arg0: i32) -> (i32, i32) {
    %c0_i32 = arith.constant 0 : i32
    %c0_i32_0 = arith.constant 0 : i32
    %c0_i32_1 = arith.constant 0 : i32
    return %c0_i32, %c0_i32_0 : i32, i32
  }
  func.func @transform_5(%arg0: i32) -> (i32, i32) {
    %c0_i32 = arith.constant 0 : i32
    %c0_i32_0 = arith.constant 0 : i32
    %c0_i32_1 = arith.constant 0 : i32
    return %c0_i32, %c0_i32_0 : i32, i32
  }
  func.func @transform_6(%arg0: i32) -> (i32, i32) {
    %c0_i32 = arith.constant 0 : i32
    %c0_i32_0 = arith.constant 0 : i32
    %c0_i32_1 = arith.constant 0 : i32
    return %c0_i32, %c0_i32_0 : i32, i32
  }
  func.func @transform_7(%arg0: i32) -> (i32, i32) {
    %c0_i32 = arith.constant 0 : i32
    %c0_i32_0 = arith.constant 0 : i32
    return %arg0, %c0_i32 : i32, i32
  }
}

</mosaic_0001>

<bundles_post_ra>
// kernel: _resmlp_forward.1
= control target key start
LH: loop header
LB: loop body
LE: loop exit
PB: predicated region body
PF: predicated region fallthrough
CT: control target
= control target key end

     0   :  { %12 = vsyncpa [#allocation3], 0  ;;  %s646_s0 = inlined_call_operand.vmem [shape: f32[8,128], index: 0, kind: input, shape index: {}]   ;;  %s647_s1 = inlined_call_operand.hbm [shape: bf16[128,128], index: 1, kind: input, shape index: {}]   ;;  %s648_s2 = inlined_call_operand.vmem [shape: f32[1,128], index: 2, kind: input, shape index: {}]   ;;  %s649_s3 = inlined_call_operand.hbm [shape: bf16[128,128], index: 3, kind: input, shape index: {}]   ;;  %s650_s4 = inlined_call_operand.vmem [shape: f32[1,128], index: 4, kind: input, shape index: {}]   ;;  %s651_s5 = inlined_call_operand.hbm [shape: bf16[128,128], index: 5, kind: input, shape index: {}]   ;;  %s652_s6 = inlined_call_operand.vmem [shape: f32[1,128], index: 6, kind: input, shape index: {}]   ;;  %s653_s7 = inlined_call_operand.hbm [shape: f32[8,128], index: 7, kind: output, shape index: {}]  }
   0x1   :  { %13 = vsyncpa [#allocation6], 0 }
   0x2   :  { %14 = vsyncpa [#allocation4], 0  ;;  %s36_s26 = sshll.u32 %s649_s3, 4  ;;  %s576_s27 = smov [#allocation5]   ;;  %s37_s26 = int_to_ptr.hbm [resolvable:$true] %s36_s26 }
   0x3   :  { %s38_s28 = sshll.u32 %s576_s27, 4  ;;  %s21_s8 = sshll.u32 %s647_s1, 4  ;;  %s39_s28 = int_to_ptr.vmem [resolvable:$true] %s38_s28  ;;  %s22_s8 = int_to_ptr.hbm [resolvable:$true] %s21_s8 }
   0x4   :  { %s577_s9 = smov 64   ;;  %s578_s10 = smov 4  }
   0x5   :  { %44 = dma.hbm_to_vmem [thread:$0]  %s37_s26, 1024, %s39_s28, [#allocation6], %s577_s9, %s577_s9, %s578_s10  }
   0x6   :  { %s579_s11 = smov [#allocation2]   ;;  %s51_s15 = sshll.u32 %s651_s5, 4  ;;  %s52_s15 = int_to_ptr.hbm [resolvable:$true] %s51_s15 }
   0x7   :  { %s23_s12 = sshll.u32 %s579_s11, 4  ;;  %s580_s3 = smov [#allocation7]   ;;  %s24_s12 = int_to_ptr.vmem [resolvable:$true] %s23_s12 }
   0x8   :  { %29 = dma.hbm_to_vmem [thread:$0]  %s22_s8, 1024, %s24_s12, [#allocation3], %s577_s9, %s577_s9, %s578_s10  }
   0x9   :  { %s53_s16 = sshll.u32 %s580_s3, 4  ;;  %s54_s16 = int_to_ptr.vmem [resolvable:$true] %s53_s16 }
   0xa   :  { %59 = dma.hbm_to_vmem [thread:$0]  %s52_s15, 1024, %s54_s16, [#allocation6], %s577_s9, %s577_s9, %s578_s10  }
   0xb   :  { %570 = dma.done.wait [#allocation3], 1024  }
   0xc   :  { %571 = vsyncadd [#allocation3], 4294966272 }
   0xd   :  { %572 = dma.done.wait [#allocation6], 2048  }
   0xe   :  { %573 = vsyncadd [#allocation6], 4294965248  ;;  %v446_v0 = vld [vmem:[#allocation2 + $0x38] sm:$0xff]  ;;  %v445_v1 = vld [vmem:[#allocation2 + $0x30] sm:$0xff]  ;;  %s581_s21 = smov [#allocation8]   ;;  %s332_s25 = sshll.u32 %s653_s7, 4  ;;  %s333_s25 = int_to_ptr.hbm [resolvable:$true] %s332_s25 }
   0xf   :  { %144 = vmatpush.bf16.msra.mxu0 %v446_v0  ;;  %v454_v2 = vld [vmem:[#allocation5 + $0x38] sm:$0xff]  ;;  %v453_v3 = vld [vmem:[#allocation5 + $0x30] sm:$0xff]  ;;  %v444_v4 = vld [vmem:[#allocation2 + $0x28] sm:$0xff]  ;;  %s330_s22 = sshll.u32 %s581_s21, 4  ;;  %s331_s22 = int_to_ptr.vmem [resolvable:$true] %s330_s22 }
  0x10   :  { %227 = vmatpush.bf16.msra.mxu1 %v454_v2  ;;  %v452_v5 = vld [vmem:[#allocation5 + $0x28] sm:$0xff]  ;;  %v443_v6 = vld [vmem:[#allocation2 + $0x20] sm:$0xff]  ;;  %v442_v8 = vld [vmem:[#allocation2 + $0x18] sm:$0xff] }
  0x11   :  { %v451_v7 = vld [vmem:[#allocation5 + $0x20] sm:$0xff]  ;;  %v450_v9 = vld [vmem:[#allocation5 + $0x18] sm:$0xff]  ;;  %v441_v10 = vld [vmem:[#allocation2 + $0x10] sm:$0xff] }
  0x12   :  { %v449_v11 = vld [vmem:[#allocation5 + $0x10] sm:$0xff]  ;;  %v440_v12 = vld [vmem:[#allocation2 + $0x8] sm:$0xff]  ;;  %v439_v13 = vld [vmem:[#allocation2] sm:$0xff] }
  0x13   :  { %145 = vmatpush.bf16.msra.mxu0 %v445_v1  ;;  %v74_v14 = vld [vmem:[%s646_s0] sm:$0xff]  ;;  %v448_v16 = vld [vmem:[#allocation5 + $0x8] sm:$0xff]  ;;  %v462_v18 = vld [vmem:[#allocation7 + $0x38] sm:$0xff] }
  0x14   :  { %228 = vmatpush.bf16.msra.mxu1 %v453_v3  ;;  %v75_v15 = vpack.c.bf16 %v74_v14, %v74_v14  ;;  %v447_v17 = vld [vmem:[#allocation5] sm:$0xff]  ;;  %310 = vmatpush.bf16.msra.mxu2 %v462_v18  ;;  %v461_v19 = vld [vmem:[#allocation7 + $0x30] sm:$0xff]  ;;  %v460_v20 = vld [vmem:[#allocation7 + $0x28] sm:$0xff] }
  0x15   :  { %v459_v21 = vld [vmem:[#allocation7 + $0x20] sm:$0xff]  ;;  %v458_v22 = vld [vmem:[#allocation7 + $0x18] sm:$0xff]  ;;  %v457_v29 = vld [vmem:[#allocation7 + $0x10] sm:$0xff] }
  0x16   :  { %v469_v23 = vld [vmem:[%s648_s2] ss:$0 sm:$0xff]  ;;  %v456_v30 = vld [vmem:[#allocation7 + $0x8] sm:$0xff] }
  0x17   :  { %146 = vmatpush.bf16.msra.mxu0 %v444_v4  ;;  %v455_v31 = vld [vmem:[#allocation7] sm:$0xff] }
  0x18   :  { %229 = vmatpush.bf16.msra.mxu1 %v452_v5  ;;  %311 = vmatpush.bf16.msra.mxu2 %v461_v19  ;;  %v470_v32 = vld [vmem:[%s650_s4] ss:$0 sm:$0xff] }
  0x19   :  { %v471_v38 = vld [vmem:[%s652_s6] ss:$0 sm:$0xff] }
  0x1b   :  { %147 = vmatpush.bf16.msra.mxu0 %v443_v6 }
  0x1c   :  { %230 = vmatpush.bf16.msra.mxu1 %v451_v7  ;;  %312 = vmatpush.bf16.msra.mxu2 %v460_v20 }
  0x1f   :  { %148 = vmatpush.bf16.msra.mxu0 %v442_v8 }
  0x20   :  { %231 = vmatpush.bf16.msra.mxu1 %v450_v9  ;;  %313 = vmatpush.bf16.msra.mxu2 %v459_v21 }
  0x23   :  { %149 = vmatpush.bf16.msra.mxu0 %v441_v10 }
  0x24   :  { %232 = vmatpush.bf16.msra.mxu1 %v449_v11  ;;  %314 = vmatpush.bf16.msra.mxu2 %v458_v22 }
  0x27   :  { %150 = vmatpush.bf16.msra.mxu0 %v440_v12 }
  0x28   :  { %233 = vmatpush.bf16.msra.mxu1 %v448_v16  ;;  %315 = vmatpush.bf16.msra.mxu2 %v457_v29 }
  0x2b   :  { %151 = vmatpush.bf16.msra.mxu0 %v439_v13 }
  0x2c   :  { %234 = vmatpush.bf16.msra.mxu1 %v447_v17  ;;  %316 = vmatpush.bf16.msra.mxu2 %v456_v30 }
  0x2e   :  { %152 = vmatmul.bf16.vlgmr.msra.gmra.mxu0 %v75_v15 }
  0x30   :  { %317 = vmatpush.bf16.msra.mxu2 %v455_v31 }
  0xab   :  { %v153_v24 = vpop.f32.mrf.mxu0 }
  0xac   :  { %v154_v25 = vadd.f32 %v469_v23, %v153_v24 }
  0xae   :  { %v157_v26 = vmax.f32 %v154_v25, 0.0 }
  0xb0   :  { %v158_v27 = vpack.c.bf16 %v157_v26, %v157_v26 }
  0xb2   :  { %235 = vmatmul.bf16.vlgmr.msra.gmra.mxu1 %v158_v27 }
  0xb3   :  { %v155_v28 = vpop.f32.mrf.mxu0 }
 0x12f   :  { %v236_v33 = vpop.f32.mrf.mxu1 }
 0x130   :  { %v237_v34 = vadd.f32 %v470_v32, %v236_v33 }
 0x132   :  { %472 = vtanh.f32 %v237_v34 }
 0x137   :  { %v238_v35 = vpop.f32.mrf.mxu1 }
 0x138   :  { %v473_v36 = vpop.eup %472 }
 0x139   :  { %v241_v37 = vpack.c.bf16 %v473_v36, %v473_v36 }
 0x13b   :  { %318 = vmatmul.bf16.vlgmr.msra.gmra.mxu2 %v241_v37 }
 0x1be   :  { %v319_v39 = vpop.f32.mrf.mxu2 }
 0x1bf   :  { %v320_v40 = vadd.f32 %v471_v38, %v319_v39 }
 0x1c1   :  { %v323_v41 = vadd.f32 %v320_v40, %v74_v14 }
 0x1c3   :  { %324 = vst [vmem:[#allocation8] sm:$0xff] %v323_v41 }
 0x1c4   :  { %335 = dma.vmem_to_hbm [thread:$0]  %s331_s22, 128, %s333_s25, [#allocation4]  }
 0x1c6   :  { %v321_v42 = vpop.f32.mrf.mxu2 }
 0x1c7   :  { %574 = dma.done.wait [#allocation4], 128  }
 0x1c8   :  { %575 = vsyncadd [#allocation4], 4294967168 }
 0x1c9   :  { %340 = vsyncpa [#allocation3], 1 }
 0x1ca   :  { %341 = vsyncpa [#allocation6], 1 }
 0x1cb   :  { %342 = vsyncpa [#allocation4], 1 }

</bundles_post_ra>
